<compile_context>
chip_gen: v5e
topology: v5e:2x2
jax: 0.10.0
libtpu: 0.0.40
codegen_flags: <defaults>
</compile_context>

<pallas_src>
import math

import jax
import jax.numpy as jnp
from jax.experimental import pallas as pl
from jax.experimental.pallas import tpu as pltpu


def signed_minmax(bit):
    return -(2 ** (bit - 1)), 2 ** (bit - 1) - 1


def _round_up(x, m):
    return (x + m - 1) // m * m


_LANE = 512                              # slab lane width (multiple of 128)
_SUB = 8                                 # sublane granularity
_CHUNK = _SUB * _LANE                    # elements per (8, 512) row group
_TARGET_BLOCK_BYTES = 4 * 1024 * 1024    # ~4 MiB per f32 operand block
_VMEM_LIMIT = 48 * 1024 * 1024           # safe on v5e/v6e (128 MiB) and v7x (64 MiB)


# ---------------------------------------------------------------------------
# Pallas kernels
# ---------------------------------------------------------------------------

def _abs_stats_kernel(x_ref, r_ref, sum_ref, cnt_ref):
    """Per-block partial stats for the LSQ observer.

    Block is (nb, 8, LANE); fold the leading axis with pure VPU adds and emit
    lane-dense (8, LANE) partials.  No serial accumulator, no cross-lane
    reduce in the kernel -> grid can be fully "parallel".
    """
    a = jnp.abs(x_ref[...].astype(jnp.float32) + r_ref[...].astype(jnp.float32))
    sum_ref[...] = jnp.sum(a, axis=0)
    cnt_ref[...] = jnp.sum((a != 0.0).astype(jnp.float32), axis=0)


def _make_requant_kernel(Qn, Qp, rQn, rQp):
    def kernel(p_ref, x_ref, r_ref, o_ref):
        # p_ref (SMEM, f32[5]): [inv_a_s, inv_res_a_s, align_int, inv_s, scale]
        inv_a_s = p_ref[0]
        inv_res_a_s = p_ref[1]
        align_int = p_ref[2]
        inv_s = p_ref[3]
        scale = p_ref[4]

        x = x_ref[...].astype(jnp.float32)
        r = r_ref[...].astype(jnp.float32)

        res_x_q = r * inv_res_a_s          # res_x / res_a_s
        x_q = x * inv_a_s                  # x / a_s
        res_x_align = jnp.round(jnp.clip(res_x_q * align_int, rQn, rQp))
        mix_x_q = x_q + res_x_align
        mix_x_round = jnp.round(jnp.clip(mix_x_q * inv_s, Qn, Qp))
        o_ref[...] = (mix_x_round * scale).astype(o_ref.dtype)

    return kernel


# ---------------------------------------------------------------------------
# Scalar glue (shared by the Pallas wrapper and the pure-JAX reference)
# ---------------------------------------------------------------------------

def _observer_scale(abs_sum, nz_cnt, Qp):
    # mean over nonzero entries of |x + res_x| ; guard against all-zero input
    mean = abs_sum / jnp.maximum(nz_cnt, 1.0)
    return 2.0 * mean / math.sqrt(Qp)


def _derive_params(scale, a_s, res_a_s, Qn, Qp, mult_bit):
    a_s = jnp.asarray(a_s, jnp.float32)
    res_a_s = jnp.asarray(res_a_s, jnp.float32)
    # align_int = round_pass(clamp(res_a_s / a_s, Qn, Qp))   (forward value)
    align_int = jnp.round(jnp.clip(res_a_s / a_s, Qn, Qp))
    # dyadic_scale(scale / a_s, mult_bit):
    #   a_s / scale ~= m / 2**e  (mult_bit-bit mantissa)  ->  s = 2**e / m
    # carry 1/s = m * 2**-e (exact) so the hot loop multiplies, not divides.
    inv = a_s / scale
    frac, exp = jnp.frexp(inv)                       # inv = frac * 2**exp
    m = jnp.round(frac * (2.0 ** mult_bit))
    e = (mult_bit - exp).astype(jnp.float32)
    inv_s = m * jnp.exp2(-e)
    return jnp.stack([1.0 / a_s, 1.0 / res_a_s, align_int, inv_s,
                      jnp.asarray(scale, jnp.float32)]).astype(jnp.float32)


def _requant_apply(x, r, params, Qn, Qp, rQn, rQp):
    """Pure-JAX mirror of the pass-2 kernel (same op formulation)."""
    inv_a_s, inv_res_a_s, align_int, inv_s, scale = (params[i] for i in range(5))
    res_x_q = r * inv_res_a_s
    x_q = x * inv_a_s
    res_x_align = jnp.round(jnp.clip(res_x_q * align_int, rQn, rQp))
    mix_x_q = x_q + res_x_align
    mix_x_round = jnp.round(jnp.clip(mix_x_q * inv_s, Qn, Qp))
    return mix_x_round * scale


# ---------------------------------------------------------------------------
# Wrapper
# ---------------------------------------------------------------------------

def qresact_forward(x, a_s, res_x, res_a_s, *, to_bit=8, bias_bit=32,
                    mult_bit=16):
    Qn, Qp = signed_minmax(to_bit)
    rQn, rQp = signed_minmax(bias_bit)

    orig_shape = x.shape
    T = x.size

    # Lane-dense slab (G_pad, 8, LANE) in the input's NATIVE dtype (no f32
    # copies in HBM).  Zero padding is neutral for the |.| sum and the nonzero
    # count, and padded outputs are sliced off at the end.
    n_groups = pl.cdiv(T, _CHUNK)
    groups_per_block = max(1, _TARGET_BLOCK_BYTES // (_CHUNK * 4))
    nb = min(groups_per_block, n_groups)
    n_groups_pad = _round_up(n_groups, nb)
    pad = n_groups_pad * _CHUNK - T

    def slab(a):
        flat = a.reshape(-1)
        if pad:
            flat = jnp.pad(flat, (0, pad))
        return flat.reshape(n_groups_pad, _SUB, _LANE)

    xs = slab(x)
    rs = slab(res_x)
    grid = (n_groups_pad // nb,)
    G = grid[0]

    cparams = pltpu.CompilerParams(
        dimension_semantics=("parallel",),
        vmem_limit_bytes=_VMEM_LIMIT)

    blk = pl.BlockSpec((nb, _SUB, _LANE), lambda i: (i, 0, 0))
    part_spec = pl.BlockSpec((None, _SUB, _LANE), lambda i: (i, 0, 0))

    # --- pass 1: observer statistics (LSQObserver mode='lsq', first calibration)
    psum, pcnt = pl.pallas_call(
        _abs_stats_kernel,
        out_shape=(jax.ShapeDtypeStruct((G, _SUB, _LANE), jnp.float32),
                   jax.ShapeDtypeStruct((G, _SUB, _LANE), jnp.float32)),
        grid=grid,
        in_specs=[blk, blk],
        out_specs=(part_spec, part_spec),
        compiler_params=cparams,
    )(xs, rs)

    abs_sum = jnp.sum(psum)
    nz_cnt = jnp.sum(pcnt)
    scale = _observer_scale(abs_sum, nz_cnt, Qp)
    params = _derive_params(scale, a_s, res_a_s, Qn, Qp, mult_bit)

    # --- pass 2: elementwise requantization hot path (native-dtype output)
    out_slab = pl.pallas_call(
        _make_requant_kernel(float(Qn), float(Qp), float(rQn), float(rQp)),
        out_shape=jax.ShapeDtypeStruct((n_groups_pad, _SUB, _LANE), x.dtype),
        grid=grid,
        in_specs=[pl.BlockSpec(memory_space=pltpu.MemorySpace.SMEM),
                  blk, blk],
        out_specs=blk,
        compiler_params=cparams,
    )(params, xs, rs)

    out = out_slab.reshape(-1)[:T].reshape(orig_shape)
    return out, scale


# ---------------------------------------------------------------------------
# Pure-JAX reference of the training-path forward (for verification)
# ---------------------------------------------------------------------------

def qresact_reference(x, a_s, res_x, res_a_s, to_bit=8, bias_bit=32,
                      mult_bit=16):
    Qn, Qp = signed_minmax(to_bit)
    rQn, rQp = signed_minmax(bias_bit)
    xf = x.astype(jnp.float32)
    rf = res_x.astype(jnp.float32)
    y = jnp.abs(xf + rf)
    abs_sum = jnp.sum(y)
    nz = jnp.sum((y != 0).astype(jnp.float32))
    scale = _observer_scale(abs_sum, nz, Qp)
    params = _derive_params(scale, a_s, res_a_s, Qn, Qp, mult_bit)
    out = _requant_apply(xf, rf, params, Qn, Qp, rQn, rQp).astype(x.dtype)
    return out, scale


if __name__ == "__main__":
    key = jax.random.PRNGKey(0)
    kx, kr = jax.random.split(key)
    B, N, C = 2, 8, 32  # batch=2, seq=8, hidden=32 (DeiT residual-stream layout)

    x = jax.random.normal(kx, (B, N, C), jnp.float32) * 0.5
    res_x = jax.random.normal(kr, (B, N, C), jnp.float32) * 0.5
    a_s = jnp.float32(0.017)      # incoming activation scale (scalar)
    res_a_s = jnp.float32(0.021)  # residual-branch activation scale (scalar)

    out, scale = qresact_forward(x, a_s, res_x, res_a_s)
    jax.block_until_ready(out)
    jax.block_until_ready(scale)

    # Check 1: observer scale against an independent pure-JAX tree reduction.
    ref_out, ref_scale = qresact_reference(x, a_s, res_x, res_a_s)
    assert jnp.allclose(scale, ref_scale, rtol=1e-5, atol=1e-7), "scale mismatch"

    # Check 2: elementwise requant path, fed with the kernel's own scale so the
    # comparison is insensitive to reduction-order ulps inside the observer.
    Qn, Qp = signed_minmax(8)
    rQn, rQp = signed_minmax(32)
    params_chk = _derive_params(scale, a_s, res_a_s, Qn, Qp, 16)
    chk = _requant_apply(x.astype(jnp.float32), res_x.astype(jnp.float32),
                         params_chk, Qn, Qp, rQn, rQp).astype(x.dtype)
    assert jnp.allclose(out, chk, rtol=1e-6, atol=1e-6), "output mismatch"

    # Sanity: full independent reference agrees closely on average.
    assert float(jnp.mean(jnp.abs(out - ref_out))) < 1e-2, "reference drift"

    print("KERNEL_OK")
</pallas_src>

<mosaic_0001>
module attributes {stable_mosaic.version = 11 : i64} {
  func.func @_abs_stats_kernel(%arg0: i32, %arg1: memref<1x8x512xf32, #tpu.memory_space<vmem>>, %arg2: memref<1x8x512xf32, #tpu.memory_space<vmem>>, %arg3: memref<1x8x512xf32, #tpu.memory_space<vmem>>, %arg4: memref<1x8x512xf32, #tpu.memory_space<vmem>>) attributes {dimension_semantics = [#tpu.dimension_semantics<parallel>], iteration_bounds = array<i64: 1>, scalar_prefetch = 0 : i64, scratch_operands = 0 : i64, tpu.core_type = #tpu.core_type<tc>, window_params = [{transform_indices = @transform_0, window_bounds = array<i64: 1, 8, 512>}, {transform_indices = @transform_1, window_bounds = array<i64: 1, 8, 512>}, {transform_indices = @transform_2, window_bounds = array<i64: 1, 8, 512>}, {transform_indices = @transform_3, window_bounds = array<i64: 1, 8, 512>}]} {
    %c0 = arith.constant 0 : index
    %c0_0 = arith.constant 0 : index
    %c0_1 = arith.constant 0 : index
    %0 = vector.load %arg1[%c0, %c0_0, %c0_1] : memref<1x8x512xf32, #tpu.memory_space<vmem>>, vector<1x8x512xf32>
    %c0_2 = arith.constant 0 : index
    %c0_3 = arith.constant 0 : index
    %c0_4 = arith.constant 0 : index
    %1 = vector.load %arg2[%c0_2, %c0_3, %c0_4] : memref<1x8x512xf32, #tpu.memory_space<vmem>>, vector<1x8x512xf32>
    %2 = arith.addf %0, %1 : vector<1x8x512xf32>
    %3 = math.absf %2 : vector<1x8x512xf32>
    %cst = arith.constant dense<0.000000e+00> : vector<8x512xf32>
    %4 = vector.multi_reduction <add>, %3, %cst [0] : vector<1x8x512xf32> to vector<8x512xf32>
    %c0_5 = arith.constant 0 : index
    %c0_6 = arith.constant 0 : index
    %c0_7 = arith.constant 0 : index
    %5 = vector.load %arg3[%c0_5, %c0_6, %c0_7] : memref<1x8x512xf32, #tpu.memory_space<vmem>>, vector<1x8x512xf32>
    %6 = vector.shape_cast %5 : vector<1x8x512xf32> to vector<8x512xf32>
    %7 = vector.shape_cast %4 : vector<8x512xf32> to vector<1x8x512xf32>
    tpu.vector_store %arg3[%c0_5, %c0_6, %c0_7], %7 {strides = array<i32>} : memref<1x8x512xf32, #tpu.memory_space<vmem>>, vector<1x8x512xf32>,
    %cst_8 = arith.constant 0.000000e+00 : f32
    %8 = vector.broadcast %cst_8 : f32 to vector<1x8x512xf32>
    %9 = arith.cmpf one, %3, %8 : vector<1x8x512xf32>
    %10 = arith.extui %9 : vector<1x8x512xi1> to vector<1x8x512xi32>
    %11 = arith.sitofp %10 : vector<1x8x512xi32> to vector<1x8x512xf32>
    %cst_9 = arith.constant dense<0.000000e+00> : vector<8x512xf32>
    %12 = vector.multi_reduction <add>, %11, %cst_9 [0] : vector<1x8x512xf32> to vector<8x512xf32>
    %c0_10 = arith.constant 0 : index
    %c0_11 = arith.constant 0 : index
    %c0_12 = arith.constant 0 : index
    %13 = vector.load %arg4[%c0_10, %c0_11, %c0_12] : memref<1x8x512xf32, #tpu.memory_space<vmem>>, vector<1x8x512xf32>
    %14 = vector.shape_cast %13 : vector<1x8x512xf32> to vector<8x512xf32>
    %15 = vector.shape_cast %12 : vector<8x512xf32> to vector<1x8x512xf32>
    tpu.vector_store %arg4[%c0_10, %c0_11, %c0_12], %15 {strides = array<i32>} : memref<1x8x512xf32, #tpu.memory_space<vmem>>, vector<1x8x512xf32>,
    return
  }
  func.func @transform_0(%arg0: i32) -> (i32, i32, i32) {
    %c0_i32 = arith.constant 0 : i32
    %c0_i32_0 = arith.constant 0 : i32
    %c0_i32_1 = arith.constant 0 : i32
    return %arg0, %c0_i32, %c0_i32_0 : i32, i32, i32
  }
  func.func @transform_1(%arg0: i32) -> (i32, i32, i32) {
    %c0_i32 = arith.constant 0 : i32
    %c0_i32_0 = arith.constant 0 : i32
    %c0_i32_1 = arith.constant 0 : i32
    return %arg0, %c0_i32, %c0_i32_0 : i32, i32, i32
  }
  func.func @transform_2(%arg0: i32) -> (i32, i32, i32) {
    %c0_i32 = arith.constant 0 : i32
    %c0_i32_0 = arith.constant 0 : i32
    %c0_i32_1 = arith.constant 0 : i32
    return %arg0, %c0_i32, %c0_i32_0 : i32, i32, i32
  }
  func.func @transform_3(%arg0: i32) -> (i32, i32, i32) {
    %c0_i32 = arith.constant 0 : i32
    %c0_i32_0 = arith.constant 0 : i32
    %c0_i32_1 = arith.constant 0 : i32
    return %arg0, %c0_i32, %c0_i32_0 : i32, i32, i32
  }
}

</mosaic_0001>

<bundles_post_ra>
// kernel: tpu_custom_call.1
= control target key start
LH: loop header
LB: loop body
LE: loop exit
PB: predicated region body
PF: predicated region fallthrough
CT: control target
= control target key end

     0   :  { %9 = vsyncpa [#allocation3], 0  ;;  %s271_s0 = inlined_call_operand.hbm [shape: f32[1,8,512], index: 0, kind: input, shape index: {}]   ;;  %s272_s1 = inlined_call_operand.hbm [shape: f32[1,8,512], index: 1, kind: input, shape index: {}]   ;;  %s273_s2 = inlined_call_operand.hbm [shape: f32[1,8,512], index: 2, kind: output, shape index: {0}]   ;;  %s274_s3 = inlined_call_operand.hbm [shape: f32[1,8,512], index: 3, kind: output, shape index: {1}]  }
   0x1   :  { %10 = vsyncpa [#allocation6], 0 }
   0x2   :  { %11 = vsyncpa [#allocation4], 0 }
   0x3   :  { %12 = vsyncpa [#allocation9], 0  ;;  %s18_s14 = sshll.u32 %s271_s0, 4  ;;  %s234_s15 = smov [#allocation2]   ;;  %s19_s14 = int_to_ptr.hbm [resolvable:$true] %s18_s14 }
   0x4   :  { %s20_s16 = sshll.u32 %s234_s15, 4  ;;  %s29_s19 = sshll.u32 %s272_s1, 4  ;;  %s21_s16 = int_to_ptr.vmem [resolvable:$true] %s20_s16  ;;  %s30_s19 = int_to_ptr.hbm [resolvable:$true] %s29_s19 }
   0x5   :  { %23 = dma.hbm_to_vmem [thread:$0]  %s19_s14, 512, %s21_s16, [#allocation3]  }
   0x6   :  { %s235_s20 = smov [#allocation5]  }
   0x7   :  { %s31_s21 = sshll.u32 %s235_s20, 4  ;;  %s32_s21 = int_to_ptr.vmem [resolvable:$true] %s31_s21 }
   0x8   :  { %34 = dma.hbm_to_vmem [thread:$0]  %s30_s19, 512, %s32_s21, [#allocation6]  }
   0x9   :  { %226 = dma.done.wait [#allocation3], 512  }
   0xa   :  { %227 = vsyncadd [#allocation3], 4294966784 }
   0xb   :  { %228 = dma.done.wait [#allocation6], 512  }
   0xc   :  { %229 = vsyncadd [#allocation6], 4294966784  ;;  %v43_v0 = vld [vmem:[#allocation2] sm:$0xff]  ;;  %v44_v2 = vld [vmem:[#allocation2 + $0x8] sm:$0xff]  ;;  %s236_s0 = smov [#allocation7]   ;;  %s94_s24 = sshll.u32 %s273_s2, 4  ;;  %s95_s24 = int_to_ptr.hbm [resolvable:$true] %s94_s24 }
   0xd   :  { %v47_v1 = vld [vmem:[#allocation5] sm:$0xff]  ;;  %v48_v4 = vld [vmem:[#allocation5 + $0x8] sm:$0xff]  ;;  %v45_v5 = vld [vmem:[#allocation2 + $0x10] sm:$0xff]  ;;  %s92_s1 = sshll.u32 %s236_s0, 4  ;;  %v237_v16 = vmov 0.0   ;;  %s238_s25 = smov [#allocation8]   ;;  %s93_s1 = int_to_ptr.vmem [resolvable:$true] %s92_s1 }
   0xe   :  { %v51_v3 = vadd.f32 %v47_v1, %v43_v0  ;;  %v49_v6 = vld [vmem:[#allocation5 + $0x10] sm:$0xff]  ;;  %v52_v7 = vadd.f32 %v48_v4, %v44_v2  ;;  %v46_v9 = vld [vmem:[#allocation2 + $0x18] sm:$0xff]  ;;  %s103_s26 = sshll.u32 %s238_s25, 4  ;;  %s105_s2 = sshll.u32 %s274_s3, 4  ;;  %s104_s26 = int_to_ptr.vmem [resolvable:$true] %s103_s26  ;;  %s106_s2 = int_to_ptr.hbm [resolvable:$true] %s105_s2 }
   0xf   :  { %v53_v8 = vadd.f32 %v49_v6, %v45_v5  ;;  %v50_v10 = vld [vmem:[#allocation5 + $0x18] sm:$0xff] }
  0x10   :  { %v55_v11 = vand.u32 2147483647, %v51_v3  ;;  %v54_v12 = vadd.f32 %v50_v10, %v46_v9  ;;  %v56_v13 = vand.u32 2147483647, %v52_v7 }
  0x11   :  { %v57_v14 = vand.u32 2147483647, %v53_v8 }
  0x12   :  { %63 = vst [vmem:[#allocation7] sm:$0xff] %v55_v11  ;;  %v58_v15 = vand.u32 2147483647, %v54_v12  ;;  %vm67_vm0 = vcmp.ne.f32.partialorder %v55_v11, 0.0  ;;  %vm68_vm1 = vcmp.ne.f32.partialorder %v56_v13, 0.0 }
  0x13   :  { %64 = vst [vmem:[#allocation7 + $0x8] sm:$0xff] %v56_v13  ;;  %v121_v17 = vsel %vm67_vm0, 1.0, %v237_v16  ;;  %vm69_vm2 = vcmp.ne.f32.partialorder %v57_v14, 0.0  ;;  %v122_v18 = vsel %vm68_vm1, 1.0, %v237_v16 }
  0x14   :  { %65 = vst [vmem:[#allocation7 + $0x10] sm:$0xff] %v57_v14  ;;  %vm70_vm3 = vcmp.ne.f32.partialorder %v58_v15, 0.0  ;;  %v123_v19 = vsel %vm69_vm2, 1.0, %v237_v16 }
  0x15   :  { %66 = vst [vmem:[#allocation7 + $0x18] sm:$0xff] %v58_v15  ;;  %v124_v20 = vsel %vm70_vm3, 1.0, %v237_v16 }
  0x16   :  { %83 = vst [vmem:[#allocation8] sm:$0xff] %v121_v17  ;;  %97 = dma.vmem_to_hbm [thread:$0]  %s93_s1, 512, %s95_s24, [#allocation4]  }
  0x17   :  { %84 = vst [vmem:[#allocation8 + $0x8] sm:$0xff] %v122_v18 }
  0x18   :  { %85 = vst [vmem:[#allocation8 + $0x10] sm:$0xff] %v123_v19 }
  0x19   :  { %86 = vst [vmem:[#allocation8 + $0x18] sm:$0xff] %v124_v20 }
  0x1a   :  { %108 = dma.vmem_to_hbm [thread:$0]  %s104_s26, 512, %s106_s2, [#allocation9]  }
  0x1b   :  { %230 = dma.done.wait [#allocation4], 512  }
  0x1c   :  { %231 = vsyncadd [#allocation4], 4294966784 }
  0x1d   :  { %232 = dma.done.wait [#allocation9], 512  }
  0x1e   :  { %233 = vsyncadd [#allocation9], 4294966784 }
  0x1f   :  { %117 = vsyncpa [#allocation3], 1 }
  0x20   :  { %118 = vsyncpa [#allocation6], 1 }
  0x21   :  { %119 = vsyncpa [#allocation4], 1 }
  0x22   :  { %120 = vsyncpa [#allocation9], 1 }

</bundles_post_ra>
